<compile_context>
chip_gen: v7x
topology: tpu7x:2x2x1
jax: 0.10.0
libtpu: 0.0.40
codegen_flags: <defaults>
</compile_context>

<pallas_src>
import functools

import jax
import jax.numpy as jnp
from jax import lax
from jax.experimental import pallas as pl
from jax.experimental.pallas import tpu as pltpu


def _round_up(x, m):
    return ((x + m - 1) // m) * m


def _unpool_kernel(idx_ref, h_ref, out_ref, *, compute_dtype, precision):
    # idx_ref: (1, K) int32 in VMEM (same block for every grid point)
    # h_ref:   (K, TN) feature tile
    # out_ref: (TM, TN) output tile at grid position (i, j)
    tm = out_ref.shape[0]
    k = h_ref.shape[0]

    row0 = pl.program_id(0) * tm
    rows = lax.broadcasted_iota(jnp.int32, (tm, k), 0) + row0      # global row ids
    sel = (rows == idx_ref[...]).astype(compute_dtype)             # (TM, K) one-hot
    hv = h_ref[...].astype(compute_dtype)                          # (K, TN)

    out = jnp.dot(sel, hv,
                  preferred_element_type=jnp.float32,
                  precision=precision)                             # MXU
    out_ref[...] = out.astype(out_ref.dtype)


def unpool(g, h, idx, *, tile_m=256, tile_n=512):
    """Pallas implementation of Unpool.forward(g, h, idx) -> (g, new_h)."""
    n = g.shape[0]
    k, d = h.shape
    idx2d = idx.astype(jnp.int32).reshape(1, k)

    # Lane-dense output: pad feature dim to a multiple of 128 (and of TN).
    d128 = _round_up(d, 128)
    tn = min(tile_n, d128)
    d_pad = _round_up(d128, tn)

    tm = min(tile_m, _round_up(n, 8))
    n_pad = _round_up(n, tm)

    h_p = h if d_pad == d else jnp.pad(h, ((0, 0), (0, d_pad - d)))

    # Selection matmul dtype: exact 0/1 in any float dtype; ints go via f32
    # (exact, and avoids the int-MXU path that v7x lacks).
    if jnp.issubdtype(h.dtype, jnp.floating):
        compute_dtype = h.dtype
    else:
        compute_dtype = jnp.float32
    # Full-precision f32 matmul so selected rows are copied bit-exactly.
    precision = (lax.Precision.HIGHEST
                 if jnp.dtype(compute_dtype) == jnp.dtype(jnp.float32)
                 else None)

    # Explicit VMEM budget (double-buffered inputs/outputs + intermediates),
    # capped well under v7x's 64 MiB physical VMEM.
    itemsize = jnp.dtype(h.dtype).itemsize
    est = (2 * (tm * tn * itemsize + k * tn * itemsize + k * 4)
           + tm * k * 4 + tm * tn * 4)
    vmem_limit = int(min(max(4 * est, 16 << 20), 48 << 20))

    grid = (n_pad // tm, d_pad // tn)

    new_h_pad = pl.pallas_call(
        functools.partial(_unpool_kernel,
                          compute_dtype=compute_dtype,
                          precision=precision),
        out_shape=jax.ShapeDtypeStruct((n_pad, d_pad), h.dtype),
        grid_spec=pltpu.PrefetchScalarGridSpec(
            num_scalar_prefetch=0,
            grid=grid,
            in_specs=[
                # idx: one small block reused by every grid point
                pl.BlockSpec((1, k), lambda i, j: (0, 0)),
                # h: full-K column strip matching the output's feature tile
                pl.BlockSpec((k, tn), lambda i, j: (0, j)),
            ],
            out_specs=pl.BlockSpec((tm, tn), lambda i, j: (i, j)),
        ),
        compiler_params=pltpu.CompilerParams(
            dimension_semantics=("parallel", "parallel"),
            vmem_limit_bytes=vmem_limit,
        ),
    )(idx2d, h_p)

    new_h = new_h_pad[:n, :d]
    # g is returned unchanged (identity pass-through, no kernel needed).
    return g, new_h


def _reference_unpool(g, h, idx):
    new_h = jnp.zeros((g.shape[0], h.shape[1]), dtype=h.dtype)
    new_h = new_h.at[idx].set(h)
    return g, new_h


if __name__ == "__main__":
    key = jax.random.PRNGKey(0)

    def check(N, K, D):
        kg, kh, ki = jax.random.split(jax.random.fold_in(key, N), 3)
        g = jax.random.normal(kg, (N, N), dtype=jnp.float32)
        h = jax.random.normal(kh, (K, D), dtype=jnp.float32)
        # distinct destination indices (as produced by top-k pooling upstream)
        idx = jax.random.permutation(ki, N)[:K].astype(jnp.int32)

        g_out, new_h = unpool(g, h, idx)
        jax.block_until_ready((g_out, new_h))

        g_ref, new_h_ref = _reference_unpool(g, h, idx)
        assert g_out.shape == (N, N) and new_h.shape == (N, D)
        assert new_h.dtype == h.dtype
        assert jnp.array_equal(g_out, g_ref)
        assert jnp.allclose(new_h, new_h_ref)

    # Spec-scale toy sizes (single tile).
    check(16, 8, 32)
    # Slightly larger: exercises row/feature padding and a multi-tile grid.
    check(300, 150, 96)

    print("KERNEL_OK")
</pallas_src>

<mosaic_0001>
module attributes {stable_mosaic.version = 11 : i64} {
  func.func @_unpool_kernel(%arg0: i32, %arg1: i32, %arg2: memref<1x8xi32, #tpu.memory_space<vmem>>, %arg3: memref<8x128xf32, #tpu.memory_space<vmem>>, %arg4: memref<16x128xf32, #tpu.memory_space<vmem>>) attributes {dimension_semantics = [#tpu.dimension_semantics<parallel>, #tpu.dimension_semantics<parallel>], iteration_bounds = array<i64: 1, 1>, scalar_prefetch = 0 : i64, scratch_operands = 0 : i64, tpu.core_type = #tpu.core_type<tc>, window_params = [{pipeline_mode = #tpu.pipeline_mode<synchronous>, transform_indices = @transform_0, window_bounds = array<i64: 1, 8>}, {transform_indices = @transform_1, window_bounds = array<i64: 8, 128>}, {transform_indices = @transform_2, window_bounds = array<i64: 16, 128>}]} {
    %c16_i32 = arith.constant 16 : i32
    %0 = arith.muli %arg0, %c16_i32 : i32
    %1 = tpu.iota {dimensions = array<i32: 0>} : vector<16x8xi32>
    %2 = vector.broadcast %0 : i32 to vector<16x8xi32>
    %3 = arith.addi %1, %2 : vector<16x8xi32>
    %c0 = arith.constant 0 : index
    %c0_0 = arith.constant 0 : index
    %4 = vector.load %arg2[%c0, %c0_0] : memref<1x8xi32, #tpu.memory_space<vmem>>, vector<1x8xi32>
    %5 = vector.broadcast %4 : vector<1x8xi32> to vector<16x8xi32>
    %6 = arith.cmpi eq, %3, %5 : vector<16x8xi32>
    %7 = arith.extui %6 : vector<16x8xi1> to vector<16x8xi32>
    %8 = arith.sitofp %7 : vector<16x8xi32> to vector<16x8xf32>
    %c0_1 = arith.constant 0 : index
    %c0_2 = arith.constant 0 : index
    %9 = vector.load %arg3[%c0_1, %c0_2] : memref<8x128xf32, #tpu.memory_space<vmem>>, vector<8x128xf32>
    %cst = arith.constant dense<0.000000e+00> : vector<16x128xf32>
    %10 = tpu.matmul %8, %9, %cst {dimension_numbers = #tpu.dot_dimension_numbers<[1], [0], [0], [1], [0, 0, 1, 1], [], []>, precision = #tpu.contract_precision<fp32>} : vector<16x8xf32>, vector<8x128xf32>, vector<16x128xf32> -> vector<16x128xf32>
    %c0_3 = arith.constant 0 : index
    %c0_4 = arith.constant 0 : index
    %11 = vector.load %arg4[%c0_3, %c0_4] : memref<16x128xf32, #tpu.memory_space<vmem>>, vector<16x128xf32>
    tpu.vector_store %arg4[%c0_3, %c0_4], %10 {strides = array<i32>} : memref<16x128xf32, #tpu.memory_space<vmem>>, vector<16x128xf32>,
    return
  }
  func.func @transform_0(%arg0: i32, %arg1: i32) -> (i32, i32) {
    %c0_i32 = arith.constant 0 : i32
    %c0_i32_0 = arith.constant 0 : i32
    %c0_i32_1 = arith.constant 0 : i32
    return %c0_i32, %c0_i32_0 : i32, i32
  }
  func.func @transform_1(%arg0: i32, %arg1: i32) -> (i32, i32) {
    %c0_i32 = arith.constant 0 : i32
    %c0_i32_0 = arith.constant 0 : i32
    return %c0_i32, %arg1 : i32, i32
  }
  func.func @transform_2(%arg0: i32, %arg1: i32) -> (i32, i32) {
    %c0_i32 = arith.constant 0 : i32
    return %arg0, %arg1 : i32, i32
  }
}

</mosaic_0001>

<bundles_post_ra>
// kernel: tpu_custom_call.1
= control target key start
LH: loop header
LB: loop body
LE: loop exit
PB: predicated region body
PF: predicated region fallthrough
CT: control target
= control target key end

     0   :  { %7 = vsyncpa [#allocation3], 0  ;;  %s781_s0 = inlined_call_operand.hbm [shape: s32[1,8], index: 0, kind: input, shape index: {}]   ;;  %s782_s1 = inlined_call_operand.hbm [shape: f32[8,128], index: 1, kind: input, shape index: {}]   ;;  %s783_s2 = inlined_call_operand.hbm [shape: f32[16,128], index: 2, kind: output, shape index: {}]  }
   0x1   :  { %8 = vsyncpa [#allocation6], 0 }
   0x2   :  { %9 = vsyncpa [#allocation4], 0  ;;  %s716_s9 = smov [#allocation2]   ;;  %s717_s11 = smov [#allocation5]  }
   0x3   :  { %s16_s10 = sshll.u32 %s716_s9, 4  ;;  %s26_s12 = sshll.u32 %s717_s11, 4  ;;  %s17_s10 = int_to_ptr.vmem [resolvable:$true] %s16_s10  ;;  %s27_s12 = int_to_ptr.vmem [resolvable:$true] %s26_s12 }
   0x4   :  { %s644_s15 = scalar_lea.hbm %s781_s0, 16 }
   0x5   :  { %p645_p0 = scmp.ne.s32.totalorder %s781_s0, %s644_s15  ;;  %p648_p1 = scmp.lt.u32.totalorder %s644_s15, %s781_s0 }
   0x7   :  { %p650_p2 = pnand %p648_p1, %p645_p0 }
   0x9   :  { %653 = shalt.err (!%p650_p2)
}
   0xa   :  { %s654_s20 = scalar_lea.vmem %s17_s10, 16  ;;  %s658_s21 = scalar_lea.vmem %s17_s10, 32 }
   0xb   :  { %p655_p3 = scmp.ne.s32.totalorder %s17_s10, %s654_s20  ;;  %p659_p4 = scmp.lt.s32.totalorder %s17_s10, %s17_s10 }
   0xc   :  { %p660_p5 = scmp.lt.s32.totalorder %s658_s21, %s654_s20 }
   0xe   :  { %p661_p6 = por %p660_p5, %p659_p4 }
  0x10   :  { %p662_p7 = pnand %p661_p6, %p655_p3 }
  0x12   :  { %665 = shalt.err (!%p662_p7)
}
  0x13   :  { %19 = dma.hbm_to_vmem [thread:$0]  %s781_s0, 16, %s17_s10, [#allocation3]  }
  0x14   :  { %s666_s26 = scalar_lea.hbm %s782_s1, 128 }
  0x15   :  { %p667_p8 = scmp.ne.s32.totalorder %s782_s1, %s666_s26  ;;  %p670_p9 = scmp.lt.u32.totalorder %s666_s26, %s782_s1 }
  0x17   :  { %p672_p10 = pnand %p670_p9, %p667_p8 }
  0x19   :  { %675 = shalt.err (!%p672_p10)
}
  0x1a   :  { %s676_s3 = scalar_lea.vmem %s27_s12, 128  ;;  %p681_p12 = scmp.lt.s32.totalorder %s27_s12, %s27_s12 }
  0x1b   :  { %p677_p11 = scmp.ne.s32.totalorder %s27_s12, %s676_s3  ;;  %p682_p13 = scmp.lt.s32.totalorder %s676_s3, %s676_s3 }
  0x1d   :  { %p683_p0 = por %p682_p13, %p681_p12 }
  0x1f   :  { %p684_p1 = pnand %p683_p0, %p677_p11 }
  0x21   :  { %687 = shalt.err (!%p684_p1)
}
  0x22   :  { %29 = dma.hbm_to_vmem [thread:$0]  %s782_s1, 128, %s27_s12, [#allocation6]  }
  0x23   :  { %710 = dma.done.wait [#allocation3], 16  }
  0x24   :  { %711 = vsyncadd [#allocation3], 4294967280 }
  0x25   :  { %712 = dma.done.wait [#allocation6], 128  }
  0x26   :  { %713 = vsyncadd [#allocation6], 4294967168  ;;  %v37_v0 = vlaneseq  ;;  %v54_v3 = vld [vmem:[#allocation5] sm:$0xff]  ;;  %v571_v4 = vld [vmem:[#allocation2] ss:$0 sm:$0xff]  ;;  %vm55_vm0 = vcmask 64512  }
  0x27   :  { %v63_v5 = vand.u32 4294901760, %v54_v3  ;;  %v718_v6 = vmov 0.0   ;;  %s719_s1 = smov [#allocation7]  }
  0x28   :  { %v38_v1 = vshrl.u32 %v37_v0, 7  ;;  %s558_s5 = sshll.u32 %s719_s1, 4  ;;  %s559_s5 = int_to_ptr.vmem [resolvable:$true] %s558_s5 }
  0x29   :  { %613 = vmatprep.subr.mxu0 %v63_v5  ;;  %598 = vmatprep.subr.mxu1 %v63_v5  ;;  %v150_v11 = vsub.f32 %v54_v3, %v63_v5  ;;  %s688_s6 = scalar_lea.vmem %s559_s5, 256  ;;  %p693_p3 = scmp.lt.s32.totalorder %s559_s5, %s559_s5 }
  0x2a   :  { %v39_v2 = vadd.s32 8, %v38_v1  ;;  %vm48_vm1 = vcmp.eq.s32.totalorder %v38_v1, %v571_v4  ;;  %614 = vmatpush3.msra.mxu0 %v63_v5  ;;  %599 = vmatpush3.msra.mxu1 %v63_v5  ;;  %p689_p2 = scmp.ne.s32.totalorder %s559_s5, %s688_s6  ;;  %p694_p4 = scmp.lt.s32.totalorder %s688_s6, %s688_s6 }
  0x2b   :  { %v572_v7 = vsel %vm48_vm1, 1.0, %v718_v6  ;;  %v151_v14 = vand.u32 4294901760, %v150_v11 }
  0x2c   :  { %vm49_vm2 = vcmp.eq.s32.totalorder %v39_v2, %v571_v4  ;;  %v57_v9 = vsel %vm55_vm0, %v572_v7, 0  ;;  %p695_p5 = por %p694_p4, %p693_p3 }
  0x2d   :  { %v573_v8 = vsel %vm49_vm2, 1.0, %v718_v6  ;;  %v129_v12 = vsub.f32 %v57_v9, %v57_v9  ;;  %v152_v17 = vsub.f32 %v150_v11, %v151_v14  ;;  %618 = vmatprep.subr.mxu0 %v151_v14 }
  0x2e   :  { %v60_v10 = vsel %vm55_vm0, %v573_v8, 0  ;;  %p696_p6 = pnand %p695_p5, %p689_p2 }
  0x2f   :  { %v139_v13 = vsub.f32 %v60_v10, %v60_v10  ;;  %v130_v15 = vand.u32 4294901760, %v129_v12  ;;  %v153_v20 = vand.u32 4294901760, %v152_v17 }
  0x31   :  { %v140_v16 = vand.u32 4294901760, %v139_v13  ;;  %615 = vmatprep.mubr.f32.mxu0 %v130_v15  ;;  %v131_v18 = vsub.f32 %v129_v12, %v130_v15  ;;  %603 = vmatprep.subr.mxu1 %v153_v20 }
  0x33   :  { %v141_v19 = vsub.f32 %v139_v13, %v140_v16  ;;  %616 = vmatmul.mubr.f32.vlgmr.msra.gmra.mrb[0].mxu0 %v140_v16  ;;  %v132_v21 = vand.u32 4294901760, %v131_v18 }
  0x34   :  { %619 = vmatpush3.msra.mxu0 %v151_v14  ;;  %620 = vmatprep.mubr.msk.f32.mxu0 %vm55_vm0, %v572_v7 }
  0x35   :  { %v142_v22 = vand.u32 4294901760, %v141_v19  ;;  %623 = vmatprep.subr.mxu0 %v63_v5  ;;  %600 = vmatprep.mubr.f32.mxu1 %v132_v21 }
  0x37   :  { %601 = vmatmul.mubr.f32.vlgmr.msra.gmra.mrb[0].mxu1 %v142_v22 }
  0x38   :  { %604 = vmatpush3.msra.mxu1 %v153_v20  ;;  %605 = vmatprep.mubr.msk.f32.mxu1 %vm55_vm0, %v572_v7 }
  0x39   :  { %608 = vmatprep.subr.mxu1 %v150_v11 }
  0x3b   :  { %621 = vmatmul.mubr.msk.f32.vlgmr.msra.gmra.mrb[0].mxu0 %vm55_vm0, %v573_v8 }
  0x3c   :  { %624 = vmatpush3.msra.mxu0 %v63_v5  ;;  %625 = vmatprep.mubr.msk.f32.mxu0 %vm55_vm0, %v572_v7 }
  0x3f   :  { %606 = vmatmul.mubr.msk.f32.vlgmr.msra.gmra.mrb[0].mxu1 %vm55_vm0, %v573_v8 }
  0x40   :  { %609 = vmatpush3.msra.mxu1 %v150_v11  ;;  %610 = vmatprep.mubr.f32.mxu1 %v129_v12 }
  0x43   :  { %626 = vmatmul.mubr.msk.f32.vlgmr.msra.gmra.mrb[0].mxu0 %vm55_vm0, %v573_v8 }
  0x47   :  { %611 = vmatmul.mubr.f32.vlgmr.msra.gmra.mrb[0].mxu1 %v139_v13 }
 0x116   :  { %v627_v23 = vpop.f32.mrb[0].mxu0 }
 0x117   :  { %v541_v24 = vpop.f32.mrb[1].mxu0 }
 0x11a   :  { %v612_v25 = vpop.f32.mrb[0].mxu1 }
 0x11b   :  { %v628_v26 = vadd.f32 %v627_v23, %v612_v25  ;;  %v300_v27 = vpop.f32.mrb[1].mxu1 }
 0x11c   :  { %v629_v28 = vadd.f32 %v541_v24, %v300_v27 }
 0x11d   :  { %552 = vst [vmem:[#allocation7 + $0x8] sm:$0xff] %v628_v26 }
 0x11e   :  { %551 = vst [vmem:[#allocation7] sm:$0xff] %v629_v28 }
 0x11f   :  { %699 = shalt.err (!%p696_p6)
}
 0x120   :  { %s700_s9 = scalar_lea.hbm %s783_s2, 256 }
 0x121   :  { %p701_p7 = scmp.ne.s32.totalorder %s783_s2, %s700_s9  ;;  %p704_p8 = scmp.lt.u32.totalorder %s700_s9, %s783_s2 }
 0x123   :  { %p706_p9 = pnand %p704_p8, %p701_p7 }
 0x125   :  { %709 = shalt.err (!%p706_p9)
}
 0x126   :  { %s720_s14 = smov 128   ;;  %s721_s15 = smov 8  }
 0x127   :  { %564 = dma.vmem_to_hbm [thread:$0]  %s559_s5, 256, %s783_s2, [#allocation4], %s720_s14, %s720_s14, %s721_s15  }
 0x128   :  { %714 = dma.done.wait [#allocation4], 256  }
 0x129   :  { %715 = vsyncadd [#allocation4], 4294967040 }
 0x12a   :  { %568 = vsyncpa [#allocation3], 1 }
 0x12b   :  { %569 = vsyncpa [#allocation6], 1 }
 0x12c   :  { %570 = vsyncpa [#allocation4], 1 }

</bundles_post_ra>
